<compile_context>
chip_gen: v7x
topology: tpu7x:2x2x1
jax: 0.10.0
libtpu: 0.0.40
codegen_flags: <defaults>
</compile_context>

<pallas_src>
import functools

import jax
import jax.numpy as jnp
from jax.experimental import pallas as pl
from jax.experimental.pallas import tpu as pltpu

_LANE = 128


def _cdiv(a, b):
    return -(-a // b)


def _round_up(x, m):
    return _cdiv(x, m) * m


def _largest_dividing_tile(total, unit, max_tile):
    """Largest multiple of `unit` that divides `total`, capped at `max_tile`."""
    best = unit
    cap = min(total, max(unit, max_tile))
    t = unit
    while t <= cap:
        if total % t == 0:
            best = t
        t += unit
    return best


def _linear_kernel_fullk(x_ref, w_ref, b_ref, o_ref):
    """One (tm, tn) output tile; full hidden dim in a single MXU pass (nk==1).

    x_ref: (tm, D)  w_ref: (D, tn)  b_ref: (1, tn) f32  o_ref: (tm, tn)
    """
    o_ref[...] = (
        jnp.dot(x_ref[...], w_ref[...], preferred_element_type=jnp.float32)
        + b_ref[...]
    ).astype(o_ref.dtype)


def _linear_kernel_ktiled(x_ref, w_ref, b_ref, o_ref, acc_ref):
    """One (tm, tn) output tile accumulated over the K (hidden) grid axis.

    x_ref: (tm, tk)  w_ref: (tk, tn)  b_ref: (1, tn)  acc_ref: (tm, tn) f32.
    """
    k = pl.program_id(2)

    @pl.when(k == 0)
    def _():
        acc_ref[...] = jnp.zeros_like(acc_ref)

    acc_ref[...] += jnp.dot(
        x_ref[...], w_ref[...], preferred_element_type=jnp.float32
    )

    @pl.when(k == pl.num_programs(2) - 1)
    def _():
        o_ref[...] = (acc_ref[...] + b_ref[...]).astype(o_ref.dtype)


def init_params(key, hidden_dim, vocab_size, dtype=jnp.float32):
    """Deterministic init mirroring the PyTorch module:
    - fc.weight: xavier_uniform_ on shape [vocab, hidden]
    - fc.bias:   nn.Linear default uniform(-1/sqrt(hidden), 1/sqrt(hidden))
    Returns (weight [V, D], bias [V]) in PyTorch layout.
    """
    kw, kb = jax.random.split(key)
    bound_w = (6.0 / (hidden_dim + vocab_size)) ** 0.5
    weight = jax.random.uniform(
        kw, (vocab_size, hidden_dim), dtype, minval=-bound_w, maxval=bound_w
    )
    bound_b = 1.0 / (hidden_dim ** 0.5)
    bias = jax.random.uniform(
        kb, (vocab_size,), dtype, minval=-bound_b, maxval=bound_b
    )
    return weight, bias


def prepare_params(weight, bias, *, compute_dtype=jnp.bfloat16):
    """One-time packing of nn.Linear params for the kernel.

    weight: [V, D] (PyTorch fc.weight layout), bias: [V].
    Returns (weight_t_padded [D_pad, V_pad] in compute_dtype, bias [V] f32).
    All weight padding / transposition / casting happens here, once, so the
    per-call wrapper never copies or re-streams the (large) weight in HBM.
    """
    V, D = weight.shape
    D_pad = _round_up(D, _LANE)
    V_pad = _round_up(V, _LANE)
    w_t = weight.T
    if (D_pad, V_pad) != (D, V):
        w_t = jnp.pad(w_t, ((0, D_pad - D), (0, V_pad - V)))
    return w_t.astype(compute_dtype), bias.astype(jnp.float32)


@functools.partial(
    jax.jit,
    static_argnames=("tm_max", "tn_max", "tk_max", "out_dtype", "vmem_fraction"),
)
def text_token_classifier(
    wm,
    weight_t,
    bias,
    *,
    tm_max=512,
    tn_max=512,
    tk_max=None,
    out_dtype=None,
    vmem_fraction=0.7,
):
    """wm: [B, T, D]; weight_t: [D_pad, V_pad] from prepare_params; bias: [V].

    Returns logits [B, T, V] == wm @ weight.T + bias (nn.Linear semantics).
    Compute dtype is whatever `prepare_params` stored the weight as; the MXU
    accumulation is always f32; `out_dtype` controls the logits dtype
    (default: wm.dtype).
    """
    B, T, D = wm.shape
    D_pad, V_pad = weight_t.shape
    V = bias.shape[0]
    assert D <= D_pad and V <= V_pad, "params were not prepared for this shape"

    out_dt = jnp.dtype(out_dtype) if out_dtype is not None else wm.dtype
    # Stream activations in the weight's (prepare-time) compute dtype so the
    # MXU runs at its native rate and operand DMA stays narrow.
    x2d = wm.reshape(B * T, D).astype(weight_t.dtype)

    M = B * T
    x_bytes = x2d.dtype.itemsize
    w_bytes = weight_t.dtype.itemsize
    o_bytes = out_dt.itemsize

    # ---- tile selection --------------------------------------------------
    sub = 8 if x_bytes >= 4 else 16  # sublane packing granularity
    ni = max(1, _cdiv(M, tm_max))
    tm = _round_up(_cdiv(M, ni), sub)
    M_pad = ni * tm

    # Vocab tile must divide the pre-padded V_pad so the weight is never
    # copied at call time; lane-dense (multiple of 128).
    tn = _largest_dividing_tile(V_pad, _LANE, tn_max)
    nj = V_pad // tn

    # Per-generation VMEM budget (v7x: 64 MiB, v5e/v6e: 128 MiB per core).
    try:
        vmem_cap = int(pltpu.get_tpu_info().vmem_capacity_bytes)
    except Exception:  # conservative fallback if the query is unavailable
        vmem_cap = 64 * 1024 * 1024
    budget = int(vmem_cap * vmem_fraction)

    def vmem_need(tk_, k_tiled):
        need = 2 * (tm * tk_ * x_bytes + tk_ * tn * w_bytes + tn * 4)
        need += 2 * tm * tn * o_bytes
        if k_tiled:
            need += tm * tn * 4  # f32 accumulator scratch
        return need

    # Prefer nk == 1 (tk == D_pad): the D x V weight is streamed exactly once
    # and the weight/bias tiles stay resident across the inner row axis.
    k_cap = D_pad if tk_max is None else max(
        _LANE, min(D_pad, _round_up(tk_max, _LANE))
    )
    tk = _LANE
    t = _LANE
    while t <= k_cap:
        if D_pad % t == 0 and vmem_need(t, t < D_pad) <= budget:
            tk = t
        t += _LANE
    nk = D_pad // tk

    # ---- per-call padding (activations + bias only; never the weight) ----
    if (M_pad, D_pad) != (M, D):
        x2d = jnp.pad(x2d, ((0, M_pad - M), (0, D_pad - D)))
    b2d = bias.astype(jnp.float32).reshape(1, V)
    if V_pad != V:
        b2d = jnp.pad(b2d, ((0, 0), (0, V_pad - V)))

    cost = pl.CostEstimate(
        flops=2 * M_pad * D_pad * V_pad,
        transcendentals=0,
        bytes_accessed=(
            nj * M_pad * D_pad * x_bytes
            + (ni if nk > 1 else 1) * D_pad * V_pad * w_bytes
            + V_pad * 4
            + M_pad * V_pad * o_bytes
        ),
    )
    vmem_limit = int(min(vmem_cap, vmem_need(tk, nk > 1) + (16 << 20)))

    if nk == 1:
        kernel = _linear_kernel_fullk
        grid = (nj, ni)
        in_specs = [
            pl.BlockSpec((tm, D_pad), lambda j, i: (i, 0)),   # activations
            pl.BlockSpec((D_pad, tn), lambda j, i: (0, j)),   # weight, resident over i
            pl.BlockSpec((1, tn), lambda j, i: (0, j)),       # bias, resident over i
        ]
        out_specs = pl.BlockSpec((tm, tn), lambda j, i: (i, j))
        scratch = []
        semantics = ("parallel", "parallel")
    else:
        kernel = _linear_kernel_ktiled
        grid = (nj, ni, nk)
        in_specs = [
            pl.BlockSpec((tm, tk), lambda j, i, k: (i, k)),
            pl.BlockSpec((tk, tn), lambda j, i, k: (k, j)),
            pl.BlockSpec((1, tn), lambda j, i, k: (0, j)),
        ]
        out_specs = pl.BlockSpec((tm, tn), lambda j, i, k: (i, j))
        scratch = [pltpu.VMEM((tm, tn), jnp.float32)]
        semantics = ("parallel", "parallel", "arbitrary")

    out2d = pl.pallas_call(
        kernel,
        out_shape=jax.ShapeDtypeStruct((M_pad, V_pad), out_dt),
        grid_spec=pltpu.PrefetchScalarGridSpec(
            num_scalar_prefetch=0,
            grid=grid,
            in_specs=in_specs,
            out_specs=out_specs,
            scratch_shapes=scratch,
        ),
        compiler_params=pltpu.CompilerParams(
            dimension_semantics=semantics,
            vmem_limit_bytes=vmem_limit,
        ),
        cost_estimate=cost,
    )(x2d, weight_t, b2d)

    if (M_pad, V_pad) != (M, V):
        out2d = out2d[:M, :V]
    return out2d.reshape(B, T, V)


if __name__ == "__main__":
    master = jax.random.PRNGKey(0)

    def run_check(idx, B, T, D, V, *, compute_dtype=jnp.float32,
                  out_dtype=None, atol, rtol, **kw):
        kx, kp = jax.random.split(jax.random.fold_in(master, idx))
        wm = jax.random.normal(kx, (B, T, D), jnp.float32)
        weight, bias = init_params(kp, D, V)
        weight_t, bias_f32 = prepare_params(
            weight, bias, compute_dtype=compute_dtype
        )

        logits = text_token_classifier(
            wm, weight_t, bias_f32, out_dtype=out_dtype, **kw
        )
        logits = jax.block_until_ready(logits)

        ref = (
            wm.reshape(B * T, D) @ weight.T.astype(jnp.float32)
            + bias.astype(jnp.float32)[None, :]
        ).reshape(B, T, V)
        expect_dtype = jnp.dtype(out_dtype) if out_dtype is not None else wm.dtype
        assert logits.shape == (B, T, V), logits.shape
        assert logits.dtype == expect_dtype, logits.dtype
        err = jnp.max(jnp.abs(logits.astype(jnp.float32) - ref))
        assert jnp.allclose(
            logits.astype(jnp.float32), ref, atol=atol, rtol=rtol
        ), f"mismatch at case {idx}: max abs err {err}"

    # 1) Base small shape implied by the module: [B, t_seq, D] -> [B, t_seq, V].
    run_check(0, B=2, T=8, D=32, V=128, atol=1e-4, rtol=1e-4)
    # 2) Ragged shapes (M, D, V not lane multiples) -> padding / slicing paths.
    run_check(1, B=2, T=7, D=48, V=200, atol=1e-4, rtol=1e-4)
    # 3) bf16 operands + bf16 logits + forced K-tiled accumulator path.
    run_check(
        2, B=2, T=8, D=256, V=384,
        compute_dtype=jnp.bfloat16, out_dtype=jnp.bfloat16,
        atol=5e-2, rtol=5e-2, tk_max=128,
    )

    print("KERNEL_OK")
</pallas_src>

<mosaic_0001>
module attributes {stable_mosaic.version = 11 : i64} {
  func.func @_linear_kernel_fullk(%arg0: i32, %arg1: i32, %arg2: memref<16x128xf32, #tpu.memory_space<vmem>>, %arg3: memref<128x128xf32, #tpu.memory_space<vmem>>, %arg4: memref<1x128xf32, #tpu.memory_space<vmem>>, %arg5: memref<16x128xf32, #tpu.memory_space<vmem>>) attributes {dimension_semantics = [#tpu.dimension_semantics<parallel>, #tpu.dimension_semantics<parallel>], iteration_bounds = array<i64: 1, 1>, scalar_prefetch = 0 : i64, scratch_operands = 0 : i64, tpu.core_type = #tpu.core_type<tc>, window_params = [{transform_indices = @transform_0, window_bounds = array<i64: 16, 128>}, {transform_indices = @transform_1, window_bounds = array<i64: 128, 128>}, {transform_indices = @transform_2, window_bounds = array<i64: 1, 128>}, {transform_indices = @transform_3, window_bounds = array<i64: 16, 128>}]} {
    %c0 = arith.constant 0 : index
    %c0_0 = arith.constant 0 : index
    %0 = vector.load %arg2[%c0, %c0_0] : memref<16x128xf32, #tpu.memory_space<vmem>>, vector<16x128xf32>
    %c0_1 = arith.constant 0 : index
    %c0_2 = arith.constant 0 : index
    %1 = vector.load %arg3[%c0_1, %c0_2] : memref<128x128xf32, #tpu.memory_space<vmem>>, vector<128x128xf32>
    %cst = arith.constant dense<0.000000e+00> : vector<16x128xf32>
    %2 = tpu.matmul %0, %1, %cst {dimension_numbers = #tpu.dot_dimension_numbers<[1], [0], [0], [1], [0, 0, 1, 1], [], []>} : vector<16x128xf32>, vector<128x128xf32>, vector<16x128xf32> -> vector<16x128xf32>
    %c0_3 = arith.constant 0 : index
    %c0_4 = arith.constant 0 : index
    %3 = vector.load %arg4[%c0_3, %c0_4] : memref<1x128xf32, #tpu.memory_space<vmem>>, vector<1x128xf32>
    %4 = vector.broadcast %3 : vector<1x128xf32> to vector<16x128xf32>
    %5 = arith.addf %2, %4 : vector<16x128xf32>
    %c0_5 = arith.constant 0 : index
    %c0_6 = arith.constant 0 : index
    %6 = vector.load %arg5[%c0_5, %c0_6] : memref<16x128xf32, #tpu.memory_space<vmem>>, vector<16x128xf32>
    tpu.vector_store %arg5[%c0_5, %c0_6], %5 {strides = array<i32>} : memref<16x128xf32, #tpu.memory_space<vmem>>, vector<16x128xf32>,
    return
  }
  func.func @transform_0(%arg0: i32, %arg1: i32) -> (i32, i32) {
    %c0_i32 = arith.constant 0 : i32
    %c0_i32_0 = arith.constant 0 : i32
    return %arg1, %c0_i32 : i32, i32
  }
  func.func @transform_1(%arg0: i32, %arg1: i32) -> (i32, i32) {
    %c0_i32 = arith.constant 0 : i32
    %c0_i32_0 = arith.constant 0 : i32
    return %c0_i32, %arg0 : i32, i32
  }
  func.func @transform_2(%arg0: i32, %arg1: i32) -> (i32, i32) {
    %c0_i32 = arith.constant 0 : i32
    %c0_i32_0 = arith.constant 0 : i32
    return %c0_i32, %arg0 : i32, i32
  }
  func.func @transform_3(%arg0: i32, %arg1: i32) -> (i32, i32) {
    %c0_i32 = arith.constant 0 : i32
    return %arg1, %arg0 : i32, i32
  }
}

</mosaic_0001>

<bundles_post_ra>
// kernel: text_token_classifier.1
= control target key start
LH: loop header
LB: loop body
LE: loop exit
PB: predicated region body
PF: predicated region fallthrough
CT: control target
= control target key end

     0   :  { %8 = vsyncpa [#allocation3], 0  ;;  %s349_s0 = inlined_call_operand.vmem [shape: f32[16,128], index: 0, kind: input, shape index: {}]   ;;  %s350_s1 = inlined_call_operand.hbm [shape: f32[128,128], index: 1, kind: input, shape index: {}]   ;;  %s351_s2 = inlined_call_operand.vmem [shape: f32[1,128], index: 2, kind: input, shape index: {}]   ;;  %s352_s3 = inlined_call_operand.hbm [shape: f32[16,128], index: 3, kind: output, shape index: {}]  }
   0x1   :  { %9 = vsyncpa [#allocation4], 0  ;;  %s286_s12 = smov [#allocation2]   ;;  %s238_s16 = scalar_lea.hbm %s350_s1, 2048 }
   0x2   :  { %s17_s13 = sshll.u32 %s286_s12, 4  ;;  %p239_p0 = scmp.ne.s32.totalorder %s350_s1, %s238_s16  ;;  %s18_s13 = int_to_ptr.vmem [resolvable:$true] %s17_s13 }
   0x3   :  { %p242_p1 = scmp.lt.u32.totalorder %s238_s16, %s350_s1 }
   0x5   :  { %p244_p2 = pnand %p242_p1, %p239_p0 }
   0x7   :  { %247 = shalt.err (!%p244_p2)
}
   0x8   :  { %s248_s21 = scalar_lea.vmem %s18_s13, 2048  ;;  %p253_p4 = scmp.lt.s32.totalorder %s18_s13, %s18_s13 }
   0x9   :  { %p249_p3 = scmp.ne.s32.totalorder %s18_s13, %s248_s21  ;;  %p254_p5 = scmp.lt.s32.totalorder %s248_s21, %s248_s21 }
   0xb   :  { %p255_p6 = por %p254_p5, %p253_p4 }
   0xd   :  { %p256_p7 = pnand %p255_p6, %p249_p3 }
   0xf   :  { %259 = shalt.err (!%p256_p7)
}
  0x10   :  { %s287_s22 = smov 128   ;;  %s288_s23 = smov 8  }
  0x11   :  { %23 = dma.hbm_to_vmem [thread:$0]  %s350_s1, 2048, %s18_s13, [#allocation3], %s287_s22, %s287_s22, %s288_s23  }
  0x12   :  { %282 = dma.done.wait [#allocation3], 2048  }
  0x13   :  { %283 = vsyncadd [#allocation3], 4294965248  ;;  %v31_v0 = vld [vmem:[#allocation2] sm:$0xff]  ;;  %v32_v1 = vld [vmem:[#allocation2 + $0x8] sm:$0xff]  ;;  %s289_s4 = smov [#allocation5]  }
  0x14   :  { %v33_v2 = vld [vmem:[#allocation2 + $0x10] sm:$0xff]  ;;  %v202_v3 = vpack.c.bf16 %v32_v1, %v31_v0  ;;  %v34_v4 = vld [vmem:[#allocation2 + $0x18] sm:$0xff]  ;;  %v35_v6 = vld [vmem:[#allocation2 + $0x20] sm:$0xff]  ;;  %s136_s5 = sshll.u32 %s289_s4, 4  ;;  %s137_s5 = int_to_ptr.vmem [resolvable:$true] %s136_s5 }
  0x15   :  { %v206_v5 = vpack.c.bf16 %v34_v4, %v33_v2  ;;  %v36_v7 = vld [vmem:[#allocation2 + $0x28] sm:$0xff]  ;;  %v29_v9 = vld [vmem:[%s349_s0] sm:$0xff]  ;;  %v37_v10 = vld [vmem:[#allocation2 + $0x30] sm:$0xff]  ;;  %s260_s6 = scalar_lea.vmem %s137_s5, 256  ;;  %p265_p9 = scmp.lt.s32.totalorder %s137_s5, %s137_s5 }
  0x16   :  { %203 = vmatprep.subr.bf16.mxu0 %v202_v3  ;;  %v210_v8 = vpack.c.bf16 %v36_v7, %v35_v6  ;;  %v38_v11 = vld [vmem:[#allocation2 + $0x38] sm:$0xff]  ;;  %199 = vmatprep.mubr.f32.mxu0 %v29_v9  ;;  %v39_v13 = vld [vmem:[#allocation2 + $0x40] sm:$0xff]  ;;  %v40_v14 = vld [vmem:[#allocation2 + $0x48] sm:$0xff]  ;;  %p261_p8 = scmp.ne.s32.totalorder %s137_s5, %s260_s6  ;;  %p266_p10 = scmp.lt.s32.totalorder %s260_s6, %s260_s6 }
  0x17   :  { %205 = vmatpush3.bf16.msra.mxu0 %v202_v3  ;;  %v214_v12 = vpack.c.bf16 %v38_v11, %v37_v10  ;;  %v218_v15 = vpack.c.bf16 %v40_v14, %v39_v13  ;;  %v41_v16 = vld [vmem:[#allocation2 + $0x50] sm:$0xff]  ;;  %v42_v17 = vld [vmem:[#allocation2 + $0x58] sm:$0xff]  ;;  %v43_v19 = vld [vmem:[#allocation2 + $0x60] sm:$0xff] }
  0x18   :  { %207 = vmatprep.subr.bf16.mxu0 %v206_v5  ;;  %v222_v18 = vpack.c.bf16 %v42_v17, %v41_v16  ;;  %v44_v20 = vld [vmem:[#allocation2 + $0x68] sm:$0xff]  ;;  %v45_v22 = vld [vmem:[#allocation2 + $0x70] sm:$0xff]  ;;  %v46_v23 = vld [vmem:[#allocation2 + $0x78] sm:$0xff]  ;;  %p267_p11 = por %p266_p10, %p265_p9 }
  0x19   :  { %v226_v21 = vpack.c.bf16 %v44_v20, %v43_v19  ;;  %v230_v24 = vpack.c.bf16 %v46_v23, %v45_v22  ;;  %v30_v25 = vld [vmem:[%s349_s0 + $0x8] sm:$0xff]  ;;  %v148_v26 = vld [vmem:[%s351_s2] ss:$0 sm:$0xff] }
  0x1a   :  { %p268_p12 = pnand %p267_p11, %p261_p8 }
  0x1b   :  { %209 = vmatpush3.bf16.msra.mxu0 %v206_v5 }
  0x1c   :  { %211 = vmatprep.subr.bf16.mxu0 %v210_v8 }
  0x1f   :  { %213 = vmatpush3.bf16.msra.mxu0 %v210_v8 }
  0x20   :  { %215 = vmatprep.subr.bf16.mxu0 %v214_v12 }
  0x23   :  { %217 = vmatpush3.bf16.msra.mxu0 %v214_v12 }
  0x24   :  { %219 = vmatprep.subr.bf16.mxu0 %v218_v15 }
  0x27   :  { %221 = vmatpush3.bf16.msra.mxu0 %v218_v15 }
  0x28   :  { %223 = vmatprep.subr.bf16.mxu0 %v222_v18 }
  0x2b   :  { %225 = vmatpush3.bf16.msra.mxu0 %v222_v18 }
  0x2c   :  { %227 = vmatprep.subr.bf16.mxu0 %v226_v21 }
  0x2f   :  { %229 = vmatpush3.bf16.msra.mxu0 %v226_v21 }
  0x30   :  { %231 = vmatprep.subr.bf16.mxu0 %v230_v24 }
  0x33   :  { %233 = vmatpush3.bf16.msra.mxu0 %v230_v24 }
  0x36   :  { %200 = vmatmul.mubr.f32.vlgmr.msra.gmra.mrb[0].mxu0 %v30_v25 }
 0x109   :  { %v201_v27 = vpop.f32.mrb[0].mxu0 }
 0x10a   :  { %v126_v28 = vadd.f32 %v201_v27, %v148_v26  ;;  %v120_v29 = vpop.f32.mrb[1].mxu0 }
 0x10b   :  { %v121_v30 = vadd.f32 %v148_v26, %v120_v29 }
 0x10c   :  { %130 = vst [vmem:[#allocation5 + $0x8] sm:$0xff] %v126_v28 }
 0x10d   :  { %129 = vst [vmem:[#allocation5] sm:$0xff] %v121_v30 }
 0x10e   :  { %271 = shalt.err (!%p268_p12)
}
 0x10f   :  { %s272_s2 = scalar_lea.hbm %s352_s3, 256 }
 0x110   :  { %p273_p13 = scmp.ne.s32.totalorder %s352_s3, %s272_s2  ;;  %p276_p0 = scmp.lt.u32.totalorder %s272_s2, %s352_s3 }
 0x112   :  { %p278_p1 = pnand %p276_p0, %p273_p13 }
 0x114   :  { %281 = shalt.err (!%p278_p1)
}
 0x115   :  { %142 = dma.vmem_to_hbm [thread:$0]  %s137_s5, 256, %s352_s3, [#allocation4], %s287_s22, %s287_s22, %s288_s23  }
 0x116   :  { %284 = dma.done.wait [#allocation4], 256  }
 0x117   :  { %285 = vsyncadd [#allocation4], 4294967040 }
 0x118   :  { %146 = vsyncpa [#allocation3], 1 }
 0x119   :  { %147 = vsyncpa [#allocation4], 1 }

</bundles_post_ra>
